<compile_context>
chip_gen: v5e
topology: v5e:2x2
jax: 0.10.0
libtpu: 0.0.40
codegen_flags: <defaults>
</compile_context>

<pallas_src>
import jax
import jax.numpy as jnp
from jax.experimental import pallas as pl
from jax.experimental.pallas import tpu as pltpu


def _gen_head_kernel(x_ref, w_ref, b_ref, o_ref):
    # x_ref: (TB, C, L)  input slab for TB batch rows (VMEM)
    # w_ref: (C, K)      conv weights, out-channel dim (==1) squeezed (VMEM)
    # b_ref: (1,)        bias (SMEM scalar)
    # o_ref: (TB, L)     lane/sublane-dense output block
    TB, C, L = x_ref.shape
    K = w_ref.shape[-1]
    pad = (K - 1) // 2                                # padding='same', K odd, stride 1

    x = x_ref[...].astype(jnp.float32)                # (TB, C, L): single upcast
    w = w_ref[...].astype(jnp.float32)                # (C, K)
    bias = b_ref[0]

    # In-register 'same' padding -> (TB, C, L + K - 1); no HBM pad pass.
    if pad > 0:
        halo = jnp.zeros((TB, C, pad), dtype=jnp.float32)
        xp = jnp.concatenate([halo, x, halo], axis=2)
    else:
        xp = x

    acc = jnp.zeros((TB, L), dtype=jnp.float32)
    for k in range(K):                                # static unroll over the K taps
        # broadcast-multiply on the whole block (VPU) + reduce over C (XLU slot)
        acc = acc + jnp.sum(xp[:, :, k:k + L] * w[:, k][None, :, None], axis=1)

    o_ref[...] = (acc + bias).astype(o_ref.dtype)


def _choose_block_batch(N, C, L, itemsize):
    """Batch rows per grid step.

    Targets: per-step input block <= ~4 MiB (double-buffered stays well under the
    default scoped-VMEM limit on v5e/v6e/v7x), >= 2 grid steps when N allows
    (megacore / v7x's 2 TensorCores), and a legal output block: its sublane dim
    (TB) must be a multiple of 8 or equal to N.
    """
    target_bytes = 4 << 20
    tb = max(1, target_bytes // max(1, C * L * itemsize))
    tb = min(tb, 1024)                     # keep the block bounded regardless of C*L
    tb = min(tb, max(1, (N + 1) // 2))     # prefer >= 2 grid steps for megacore
    if tb >= N:
        return N                           # block dims equal full dims -> always legal
    if tb >= 8:
        return (tb // 8) * 8               # sublane-dense, legal output block
    # Rows are large or the batch is small: 8 rows/step (or the whole batch if N <= 8).
    return N if N <= 8 else 8


def gen_head_forward(tup, weight, bias, *, block_batch=None):
    """Pallas implementation of GenHead.forward.

    tup    : (x0, x1, nn_vec); only nn_vec is used, shape (N, C, L)
    weight : (1, C, K) conv1d weight (out_channels = 1)
    bias   : (1,)      conv1d bias
    returns: (N, 1, L)
    """
    _, _, nn_vec = tup
    N, C, L = nn_vec.shape
    out_ch, c_w, K = weight.shape
    assert out_ch == 1 and c_w == C
    assert K % 2 == 1, "padding='same' here assumes an odd kernel size (K=5 in GenHead)"

    w2d = weight[0]                                  # (C, K)
    b1d = bias.reshape(1).astype(jnp.float32)        # SMEM scalar

    TB = (_choose_block_batch(N, C, L, nn_vec.dtype.itemsize)
          if block_batch is None else block_batch)
    grid = (pl.cdiv(N, TB),)

    out2d = pl.pallas_call(
        _gen_head_kernel,
        out_shape=jax.ShapeDtypeStruct((N, L), nn_vec.dtype),
        grid=grid,
        in_specs=[
            pl.BlockSpec((TB, C, L), lambda n: (n, 0, 0)),   # single dense HBM read of nn_vec
            pl.BlockSpec((C, K), lambda n: (0, 0)),          # small weight block, constant
            pl.BlockSpec(memory_space=pltpu.SMEM),           # bias scalar
        ],
        out_specs=pl.BlockSpec((TB, L), lambda n: (n, 0)),   # dense output slab
        compiler_params=pltpu.CompilerParams(
            dimension_semantics=("parallel",)),              # batch blocks independent
    )(nn_vec, w2d, b1d)

    return out2d.reshape(N, 1, L)


def _reference(nn_vec, weight, bias):
    # Pure-JAX reference (PyTorch conv1d == cross-correlation).
    out = jax.lax.conv_general_dilated(
        nn_vec, weight,
        window_strides=(1,), padding="SAME",
        dimension_numbers=("NCH", "OIH", "NCH"))
    return out + bias.reshape(1, 1, 1)


if __name__ == "__main__":
    key = jax.random.PRNGKey(0)
    N, ngf, L, K = 2, 4, 16, 5

    k0, k1, k2, kw, kb = jax.random.split(key, 5)
    x0 = jax.random.normal(k0, (N, ngf, L), dtype=jnp.float32)
    x1 = jax.random.normal(k1, (N, ngf, L), dtype=jnp.float32)
    nn_vec = jax.random.normal(k2, (N, ngf, L), dtype=jnp.float32)

    # Deterministic param init mimicking PyTorch Conv1d default (U[-bound, bound]).
    bound = 1.0 / jnp.sqrt(ngf * K)
    weight = jax.random.uniform(kw, (1, ngf, K), minval=-bound, maxval=bound,
                                dtype=jnp.float32)
    bias = jax.random.uniform(kb, (1,), minval=-bound, maxval=bound,
                              dtype=jnp.float32)

    out = gen_head_forward((x0, x1, nn_vec), weight, bias)
    out = jax.block_until_ready(out)

    ref = _reference(nn_vec, weight, bias)
    assert out.shape == (N, 1, L)
    assert jnp.allclose(out, ref, atol=1e-5, rtol=1e-5)

    print("KERNEL_OK")
</pallas_src>

<mosaic_0001>
module attributes {stable_mosaic.version = 11 : i64} {
  func.func @_gen_head_kernel(%arg0: i32, %arg1: memref<2x4x16xf32, #tpu.memory_space<vmem>>, %arg2: memref<4x5xf32, #tpu.memory_space<vmem>>, %arg3: memref<1xf32, #tpu.memory_space<smem>>, %arg4: memref<2x16xf32, #tpu.memory_space<vmem>>) attributes {dimension_semantics = [#tpu.dimension_semantics<parallel>], iteration_bounds = array<i64: 1>, scalar_prefetch = 0 : i64, scratch_operands = 0 : i64, tpu.core_type = #tpu.core_type<tc>, window_params = [{transform_indices = @transform_0, window_bounds = array<i64: 2, 4, 16>}, {pipeline_mode = #tpu.pipeline_mode<synchronous>, transform_indices = @transform_1, window_bounds = array<i64: 4, 5>}, {transform_indices = @transform_2, window_bounds = array<i64: 1>}, {transform_indices = @transform_3, window_bounds = array<i64: 2, 16>}]} {
    %c0 = arith.constant 0 : index
    %c0_0 = arith.constant 0 : index
    %c0_1 = arith.constant 0 : index
    %0 = vector.load %arg1[%c0, %c0_0, %c0_1] : memref<2x4x16xf32, #tpu.memory_space<vmem>>, vector<2x4x16xf32>
    %c0_2 = arith.constant 0 : index
    %c0_3 = arith.constant 0 : index
    %1 = vector.load %arg2[%c0_2, %c0_3] : memref<4x5xf32, #tpu.memory_space<vmem>>, vector<4x5xf32>
    %c0_4 = arith.constant 0 : index
    %2 = memref.load %arg3[%c0_4] : memref<1xf32, #tpu.memory_space<smem>>
    %cst = arith.constant 0.000000e+00 : f32
    %3 = vector.broadcast %cst : f32 to vector<2x4x2xf32>
    %4 = tpu.concatenate %3, %0, %3 in 2 : vector<2x4x2xf32>, vector<2x4x16xf32>, vector<2x4x2xf32> -> vector<2x4x20xf32>
    %cst_5 = arith.constant 0.000000e+00 : f32
    %5 = vector.broadcast %cst_5 : f32 to vector<2x16xf32>
    %6 = vector.extract_strided_slice %4 {offsets = [0, 0, 0], sizes = [2, 4, 16], strides = [1, 1, 1]} : vector<2x4x20xf32> to vector<2x4x16xf32>
    %7 = vector.extract_strided_slice %1 {offsets = [0, 0], sizes = [4, 1], strides = [1, 1]} : vector<4x5xf32> to vector<4x1xf32>
    %8 = vector.shape_cast %7 : vector<4x1xf32> to vector<4xf32>
    %9 = vector.shape_cast %8 : vector<4xf32> to vector<1x4x1xf32>
    %10 = vector.broadcast %9 : vector<1x4x1xf32> to vector<2x4x16xf32>
    %11 = arith.mulf %6, %10 : vector<2x4x16xf32>
    %cst_6 = arith.constant dense<0.000000e+00> : vector<2x16xf32>
    %12 = vector.multi_reduction <add>, %11, %cst_6 [1] : vector<2x4x16xf32> to vector<2x16xf32>
    %13 = arith.addf %5, %12 : vector<2x16xf32>
    %14 = vector.extract_strided_slice %4 {offsets = [0, 0, 1], sizes = [2, 4, 16], strides = [1, 1, 1]} : vector<2x4x20xf32> to vector<2x4x16xf32>
    %15 = vector.extract_strided_slice %1 {offsets = [0, 1], sizes = [4, 1], strides = [1, 1]} : vector<4x5xf32> to vector<4x1xf32>
    %16 = vector.shape_cast %15 : vector<4x1xf32> to vector<4xf32>
    %17 = vector.shape_cast %16 : vector<4xf32> to vector<1x4x1xf32>
    %18 = vector.broadcast %17 : vector<1x4x1xf32> to vector<2x4x16xf32>
    %19 = arith.mulf %14, %18 : vector<2x4x16xf32>
    %cst_7 = arith.constant dense<0.000000e+00> : vector<2x16xf32>
    %20 = vector.multi_reduction <add>, %19, %cst_7 [1] : vector<2x4x16xf32> to vector<2x16xf32>
    %21 = arith.addf %13, %20 : vector<2x16xf32>
    %22 = vector.extract_strided_slice %4 {offsets = [0, 0, 2], sizes = [2, 4, 16], strides = [1, 1, 1]} : vector<2x4x20xf32> to vector<2x4x16xf32>
    %23 = vector.extract_strided_slice %1 {offsets = [0, 2], sizes = [4, 1], strides = [1, 1]} : vector<4x5xf32> to vector<4x1xf32>
    %24 = vector.shape_cast %23 : vector<4x1xf32> to vector<4xf32>
    %25 = vector.shape_cast %24 : vector<4xf32> to vector<1x4x1xf32>
    %26 = vector.broadcast %25 : vector<1x4x1xf32> to vector<2x4x16xf32>
    %27 = arith.mulf %22, %26 : vector<2x4x16xf32>
    %cst_8 = arith.constant dense<0.000000e+00> : vector<2x16xf32>
    %28 = vector.multi_reduction <add>, %27, %cst_8 [1] : vector<2x4x16xf32> to vector<2x16xf32>
    %29 = arith.addf %21, %28 : vector<2x16xf32>
    %30 = vector.extract_strided_slice %4 {offsets = [0, 0, 3], sizes = [2, 4, 16], strides = [1, 1, 1]} : vector<2x4x20xf32> to vector<2x4x16xf32>
    %31 = vector.extract_strided_slice %1 {offsets = [0, 3], sizes = [4, 1], strides = [1, 1]} : vector<4x5xf32> to vector<4x1xf32>
    %32 = vector.shape_cast %31 : vector<4x1xf32> to vector<4xf32>
    %33 = vector.shape_cast %32 : vector<4xf32> to vector<1x4x1xf32>
    %34 = vector.broadcast %33 : vector<1x4x1xf32> to vector<2x4x16xf32>
    %35 = arith.mulf %30, %34 : vector<2x4x16xf32>
    %cst_9 = arith.constant dense<0.000000e+00> : vector<2x16xf32>
    %36 = vector.multi_reduction <add>, %35, %cst_9 [1] : vector<2x4x16xf32> to vector<2x16xf32>
    %37 = arith.addf %29, %36 : vector<2x16xf32>
    %38 = vector.extract_strided_slice %4 {offsets = [0, 0, 4], sizes = [2, 4, 16], strides = [1, 1, 1]} : vector<2x4x20xf32> to vector<2x4x16xf32>
    %39 = vector.extract_strided_slice %1 {offsets = [0, 4], sizes = [4, 1], strides = [1, 1]} : vector<4x5xf32> to vector<4x1xf32>
    %40 = vector.shape_cast %39 : vector<4x1xf32> to vector<4xf32>
    %41 = vector.shape_cast %40 : vector<4xf32> to vector<1x4x1xf32>
    %42 = vector.broadcast %41 : vector<1x4x1xf32> to vector<2x4x16xf32>
    %43 = arith.mulf %38, %42 : vector<2x4x16xf32>
    %cst_10 = arith.constant dense<0.000000e+00> : vector<2x16xf32>
    %44 = vector.multi_reduction <add>, %43, %cst_10 [1] : vector<2x4x16xf32> to vector<2x16xf32>
    %45 = arith.addf %37, %44 : vector<2x16xf32>
    %46 = vector.broadcast %2 : f32 to vector<2x16xf32>
    %47 = arith.addf %45, %46 : vector<2x16xf32>
    %c0_11 = arith.constant 0 : index
    %c0_12 = arith.constant 0 : index
    %48 = vector.load %arg4[%c0_11, %c0_12] : memref<2x16xf32, #tpu.memory_space<vmem>>, vector<2x16xf32>
    tpu.vector_store %arg4[%c0_11, %c0_12], %47 {strides = array<i32>} : memref<2x16xf32, #tpu.memory_space<vmem>>, vector<2x16xf32>,
    return
  }
  func.func @transform_0(%arg0: i32) -> (i32, i32, i32) {
    %c0_i32 = arith.constant 0 : i32
    %c0_i32_0 = arith.constant 0 : i32
    %c0_i32_1 = arith.constant 0 : i32
    return %arg0, %c0_i32, %c0_i32_0 : i32, i32, i32
  }
  func.func @transform_1(%arg0: i32) -> (i32, i32) {
    %c0_i32 = arith.constant 0 : i32
    %c0_i32_0 = arith.constant 0 : i32
    %c0_i32_1 = arith.constant 0 : i32
    return %c0_i32, %c0_i32_0 : i32, i32
  }
  func.func @transform_2(%arg0: i32) -> i32 {
    %c0_i32 = arith.constant 0 : i32
    %c0_i32_0 = arith.constant 0 : i32
    return %c0_i32 : i32
  }
  func.func @transform_3(%arg0: i32) -> (i32, i32) {
    %c0_i32 = arith.constant 0 : i32
    %c0_i32_0 = arith.constant 0 : i32
    return %arg0, %c0_i32 : i32, i32
  }
}

</mosaic_0001>

<bundles_post_ra>
// kernel: tpu_custom_call.1
= control target key start
LH: loop header
LB: loop body
LE: loop exit
PB: predicated region body
PF: predicated region fallthrough
CT: control target
= control target key end

     0   :  { %9 = vsyncpa [#allocation4], 0  ;;  %s411_s0 = inlined_call_operand.hbm [shape: f32[2,4,16], index: 0, kind: input, shape index: {}]   ;;  %s412_s1 = inlined_call_operand.hbm [shape: f32[4,5], index: 1, kind: input, shape index: {}]   ;;  %s413_s2 = inlined_call_operand.<no memory space> [shape: f32[1], index: 2, kind: input, shape index: {}]   ;;  %s414_s3 = inlined_call_operand.hbm [shape: f32[2,16], index: 3, kind: output, shape index: {}]  }
   0x1   :  { %10 = vsyncpa [#allocation7], 0 }
   0x2   :  { %11 = vsyncpa [#allocation5], 0  ;;  %s16_s14 = sshll.u32 %s411_s0, 4  ;;  %s340_s15 = smov [#allocation3]   ;;  %s17_s14 = int_to_ptr.hbm [resolvable:$true] %s16_s14 }
   0x3   :  { %s18_s16 = sshll.u32 %s340_s15, 4  ;;  %s30_s19 = sshll.u32 %s412_s1, 4  ;;  %s19_s16 = int_to_ptr.vmem [resolvable:$true] %s18_s16  ;;  %s31_s19 = int_to_ptr.hbm [resolvable:$true] %s30_s19 }
   0x4   :  { %s341_s20 = smov 64   ;;  %s342_s21 = smov 4  }
   0x5   :  { %24 = dma.hbm_to_vmem [thread:$0]  %s17_s14, 128, %s19_s16, [#allocation4], %s341_s20, %s341_s20, %s342_s21  }
   0x6   :  { %s343_s22 = smov [#allocation6]  }
   0x7   :  { %s32_s23 = sshll.u32 %s343_s22, 4  ;;  %s33_s23 = int_to_ptr.vmem [resolvable:$true] %s32_s23 }
   0x8   :  { %35 = dma.hbm_to_vmem [thread:$0]  %s31_s19, 64, %s33_s23, [#allocation7]  }
   0x9   :  { %334 = dma.done.wait [#allocation4], 128  }
   0xa   :  { %335 = vsyncadd [#allocation4], 4294967168 }
   0xb   :  { %336 = dma.done.wait [#allocation7], 64  }
   0xc   :  { %337 = vsyncadd [#allocation7], 4294967232  ;;  %v344_v0 = vmov 1   ;;  %v345_v1 = vmov 0   ;;  %v346_v2 = vmov 3   ;;  %s347_s0 = smov 2  }
   0xd   :  { %256 = vset.pattern.permute.xlu1 %v344_v0  ;;  %260 = vset.pattern.permute.xlu0 %v345_v1  ;;  %v48_v3 = vld [vmem:[#allocation6] sm:$0xf]  ;;  %v47_v4 = vld [vmem:[#allocation3 + $0x4] sm:$0xf]  ;;  %v46_v5 = vld [vmem:[#allocation3] sm:$0xf] }
   0xe   :  { %258 = vset.pattern.permute.xlu2 %v346_v2  ;;  %89 = vperm.xlu1 %256, %v48_v3   ;;  %v348_v6 = vmov 2   ;;  %v349_v7 = vmov 4   ;;  %vm58_vm0 = vcmask 15360   ;;  %vm61_vm1 = vcmask 146432   ;;  %s350_s1 = smov 127   ;;  %s351_s24 = smov 125  }
   0xf   :  { %54 = vrot.lane.b32.xlu0 %v47_v4, %s347_s0  ;;  %151 = vperm.xlu2 %258, %v48_v3   ;;  %vm94_vm2 = vcmask 134152   ;;  %vm156_vm3 = vcmask 150552   ;;  %vm125_vm4 = vcmask 142352   ;;  %vm187_vm5 = vcmask 158752   ;;  %s352_s25 = smov 126   ;;  %s353_s26 = smov 124  }
  0x10   :  { %vm71_vm6 = vcmask 125952   ;;  %s354_s29 = smov [#allocation8]   ;;  %s230_s6 = sshll.u32 %s414_s3, 4  ;;  %vm218_vm7 = vcmask 1041409   ;;  %vm221_vm8 = vcmask 123904   ;;  %s231_s6 = int_to_ptr.hbm [resolvable:$true] %s230_s6 }
  0x11   :  { %s228_s30 = sshll.u32 %s354_s29, 4  ;;  %s229_s30 = int_to_ptr.vmem [resolvable:$true] %s228_s30 }
  0x16   :  { %257 = vset.pattern.permute.xlu1 %v348_v6 }
  0x17   :  { %52 = vrot.lane.b32.xlu0 %v46_v5, %s347_s0  ;;  %120 = vperm.xlu1 %257, %v48_v3  }
  0x18   :  { %259 = vset.pattern.permute.xlu2 %v349_v7 }
  0x19   :  { %182 = vperm.xlu2 %259, %v48_v3  }
  0x1f   :  { %66 = vperm.xlu0 %260, %v48_v3  }
  0x27   :  { %261 = vset.pattern.permute.xlu0 %v349_v7 }
  0x69   :  { %v152_v8 = vpop.permute.xlu2 %151 }
  0x73   :  { %v183_v22 = vpop.permute.xlu2 %182 }
  0x80   :  { %v90_v10 = vpop.permute.xlu1 %89 }
  0x81   :  { %v55_v9 = vpop.permute.xlu0 %54 }
  0x82   :  { %v60_v11 = vsel %vm58_vm0, 0.0, %v55_v9 }
  0x83   :  { %v383_v12 = vsel %vm61_vm1, %v60_v11, 0.0 }
  0x84   :  { %v155_v13 = vmul.f32 %v152_v8, %v383_v12  ;;  %v93_v14 = vmul.f32 %v90_v10, %v383_v12  ;;  %v186_v32 = vmul.f32 %v183_v22, %v383_v12 }
  0x86   :  { %v102_v15 = vsel %vm94_vm2, %v93_v14, 0.0  ;;  %v164_v16 = vsel %vm156_vm3, %v155_v13, 0.0  ;;  %v195_v51 = vsel %vm187_vm5, %v186_v32, 0.0 }
  0x87   :  { %v103_v17 = vrot.slane %v102_v15, 4  ;;  %v165_v18 = vrot.slane %v164_v16, 4  ;;  %v196_v59 = vrot.slane %v195_v51, 4 }
  0x89   :  { %v104_v19 = vadd.f32 %v103_v17, %v102_v15  ;;  %v53_v20 = vpop.permute.xlu0 %52  ;;  %v166_v21 = vadd.f32 %v165_v18, %v164_v16  ;;  %v121_v24 = vpop.permute.xlu1 %120  ;;  %v197_v5 = vadd.f32 %v196_v59, %v195_v51 }
  0x8a   :  { %v59_v23 = vsel %vm58_vm0, 0.0, %v53_v20  ;;  %v124_v27 = vmul.f32 %v121_v24, %v383_v12 }
  0x8b   :  { %v105_v25 = vrot.slane %v104_v19, 2  ;;  %v391_v26 = vsel %vm61_vm1, %v59_v23, 0.0  ;;  %v167_v35 = vrot.slane %v166_v21, 2 }
  0x8c   :  { %v92_v28 = vmul.f32 %v90_v10, %v391_v26  ;;  %v154_v29 = vmul.f32 %v152_v8, %v391_v26  ;;  %v185_v30 = vmul.f32 %v183_v22, %v391_v26  ;;  %v123_v31 = vmul.f32 %v121_v24, %v391_v26 }
  0x8d   :  { %v133_v33 = vsel %vm125_vm4, %v124_v27, 0.0  ;;  %v106_v34 = vadd.f32 %v105_v25, %v104_v19  ;;  %v168_v42 = vadd.f32 %v167_v35, %v166_v21  ;;  %v198_v10 = vrot.slane %v197_v5, 2 }
  0x8e   :  { %v126_v36 = vsel %vm125_vm4, %v123_v31, 0.0  ;;  %v134_v37 = vrot.slane %v133_v33, 4  ;;  %v95_v38 = vsel %vm94_vm2, %v92_v28, 0.0  ;;  %v188_v39 = vsel %vm187_vm5, %v185_v30, 0.0 }
  0x8f   :  { %v127_v40 = vrot.slane %v126_v36, 4  ;;  %v107_v41 = vrot.slane %v106_v34, 1  ;;  %v96_v43 = vrot.slane %v95_v38, 4  ;;  %v189_v45 = vrot.slane %v188_v39, 4 }
  0x90   :  { %v135_v44 = vadd.f32 %v134_v37, %v133_v33  ;;  %v157_v46 = vsel %vm156_vm3, %v154_v29, 0.0  ;;  %v169_v49 = vrot.slane %v168_v42, 1  ;;  %v199_v16 = vadd.f32 %v198_v10, %v197_v5 }
  0x91   :  { %v128_v47 = vadd.f32 %v127_v40, %v126_v36  ;;  %v108_v48 = vadd.f32 %v107_v41, %v106_v34  ;;  %v97_v50 = vadd.f32 %v96_v43, %v95_v38  ;;  %v190_v53 = vadd.f32 %v189_v45, %v188_v39  ;;  %v67_v19 = vpop.permute.xlu0 %66 }
  0x92   :  { %v136_v52 = vrot.slane %v135_v44, 2  ;;  %v170_v54 = vadd.f32 %v169_v49, %v168_v42  ;;  %v158_v56 = vrot.slane %v157_v46, 4  ;;  %v200_v17 = vrot.slane %v199_v16, 1 }
  0x93   :  { %113 = vrot.lane.b32.xlu1 %v108_v48, %s350_s1  ;;  %v98_v55 = vrot.slane %v97_v50, 2  ;;  %v191_v58 = vrot.slane %v190_v53, 2  ;;  %v129_v60 = vrot.slane %v128_v47, 2  ;;  %v70_v20 = vmul.f32 %v67_v19, %v383_v12 }
  0x94   :  { %v137_v57 = vadd.f32 %v136_v52, %v135_v44  ;;  %175 = vrot.lane.b32.xlu0 %v170_v54, %s351_s24  ;;  %v159_v62 = vadd.f32 %v158_v56, %v157_v46  ;;  %v201_v18 = vadd.f32 %v200_v17, %v199_v16  ;;  %v69_v22 = vmul.f32 %v67_v19, %v391_v26 }
  0x95   :  { %v99_v61 = vadd.f32 %v98_v55, %v97_v50  ;;  %v192_v0 = vadd.f32 %v191_v58, %v190_v53  ;;  %v130_v8 = vadd.f32 %v129_v60, %v128_v47  ;;  %v79_v21 = vsel %vm71_vm6, %v70_v20, 0.0 }
  0x96   :  { %v138_v63 = vrot.slane %v137_v57, 1  ;;  %v160_v2 = vrot.slane %v159_v62, 2  ;;  %v80_v23 = vrot.slane %v79_v21, 4  ;;  %v72_v24 = vsel %vm71_vm6, %v69_v22, 0.0 }
  0x97   :  { %v100_v1 = vrot.slane %v99_v61, 1  ;;  %v193_v4 = vrot.slane %v192_v0, 1  ;;  %v131_v13 = vrot.slane %v130_v8, 1  ;;  %v73_v27 = vrot.slane %v72_v24, 4 }
  0x98   :  { %v139_v3 = vadd.f32 %v138_v63, %v137_v57  ;;  %v161_v7 = vadd.f32 %v160_v2, %v159_v62  ;;  %v81_v25 = vadd.f32 %v80_v23, %v79_v21  ;;  %v212_v46 = vstv %s413_s2 }
  0x99   :  { %v101_v6 = vadd.f32 %v100_v1, %v99_v61  ;;  %v194_v9 = vadd.f32 %v193_v4, %v192_v0  ;;  %v132_v15 = vadd.f32 %v131_v13, %v130_v8  ;;  %v74_v30 = vadd.f32 %v73_v27, %v72_v24 }
  0x9a   :  { %v162_v11 = vrot.slane %v161_v7, 1  ;;  %v82_v29 = vrot.slane %v81_v25, 2 }
  0x9b   :  { %144 = vrot.lane.b32.xlu1 %v139_v3, %s352_s25  ;;  %111 = vrot.lane.b32.xlu2 %v101_v6, %s350_s1  ;;  %v75_v32 = vrot.slane %v74_v30, 2 }
  0x9c   :  { %204 = vrot.lane.b32.xlu0 %v194_v9, %s353_s26  ;;  %v163_v14 = vadd.f32 %v162_v11, %v161_v7  ;;  %v83_v31 = vadd.f32 %v82_v29, %v81_v25 }
  0x9d   :  { %v76_v36 = vadd.f32 %v75_v32, %v74_v30 }
  0x9e   :  { %v84_v34 = vrot.slane %v83_v31, 1 }
  0x9f   :  { %v77_v38 = vrot.slane %v76_v36, 1 }
  0xa0   :  { %v85_v37 = vadd.f32 %v84_v34, %v83_v31 }
  0xa1   :  { %v78_v26 = vadd.f32 %v77_v38, %v76_v36 }
  0xa3   :  { %173 = vrot.lane.b32.xlu1 %v163_v14, %s351_s24  ;;  %142 = vrot.lane.b32.xlu2 %v132_v15, %s352_s25 }
  0xab   :  { %206 = vrot.lane.b32.xlu2 %v201_v18, %s353_s26 }
  0xf5   :  { %v112_v28 = vpop.permute.xlu2 %111 }
  0xf6   :  { %v117_v44 = vadd.f32 %v112_v28, %v78_v26 }
  0xfd   :  { %v143_v35 = vpop.permute.xlu2 %142 }
  0xfe   :  { %v148_v47 = vadd.f32 %v143_v35, %v117_v44 }
 0x105   :  { %v114_v33 = vpop.permute.xlu1 %113  ;;  %v207_v43 = vpop.permute.xlu2 %206 }
 0x106   :  { %v118_v12 = vadd.f32 %v114_v33, %v85_v37  ;;  %v176_v41 = vpop.permute.xlu0 %175 }
 0x10d   :  { %v145_v39 = vpop.permute.xlu1 %144 }
 0x10e   :  { %v149_v40 = vadd.f32 %v145_v39, %v118_v12  ;;  %v205_v51 = vpop.permute.xlu0 %204 }
 0x110   :  { %v180_v42 = vadd.f32 %v176_v41, %v149_v40 }
 0x112   :  { %v211_v45 = vadd.f32 %v207_v43, %v180_v42 }
 0x114   :  { %v214_v50 = vadd.f32 %v212_v46, %v211_v45 }
 0x115   :  { %v174_v48 = vpop.permute.xlu1 %173 }
 0x116   :  { %v179_v49 = vadd.f32 %v174_v48, %v148_v47  ;;  %v217_v54 = vrot.slane %v214_v50, 7 }
 0x118   :  { %v210_v52 = vadd.f32 %v205_v51, %v179_v49 }
 0x11a   :  { %v213_v53 = vadd.f32 %v212_v46, %v210_v52 }
 0x11c   :  { %v219_v55 = vsel %vm218_vm7, %v217_v54, %v213_v53 }
 0x11d   :  { %222 = vst.msk [vmem:[#allocation8] sm:$0x3] %vm221_vm8, %v219_v55 }
 0x11e   :  { %233 = dma.vmem_to_hbm [thread:$0]  %s229_s30, 32, %s231_s6, [#allocation5]  }
 0x11f   :  { %338 = dma.done.wait [#allocation5], 32  }
 0x120   :  { %339 = vsyncadd [#allocation5], 4294967264 }
 0x121   :  { %238 = vsyncpa [#allocation4], 1 }
 0x122   :  { %239 = vsyncpa [#allocation7], 1 }
 0x123   :  { %240 = vsyncpa [#allocation5], 1 }

</bundles_post_ra>
